<compile_context>
chip_gen: v5e
topology: v5e:2x2
jax: 0.10.0
libtpu: 0.0.40
codegen_flags: <defaults>
</compile_context>

<pallas_src>
import jax
import jax.numpy as jnp
from jax.experimental import pallas as pl
from jax.experimental.pallas import tpu as pltpu

# Synthetic env dims for the 2D manipulator arm (small, consistent with DQN arm env).
NUM_STATES = 8
NUM_ACTIONS = 4
HIDDEN1 = 50
HIDDEN2 = 30

MAX_TB = 4096          # max batch-tile rows per grid step (multiple of 8)


def _round_up(n, m):
    return ((n + m - 1) // m) * m


def _mlp_kernel(x_ref, w1_ref, b1_ref, w2_ref, b2_ref, w3_ref, b3_ref, out_ref):
    """One batch tile of the full 3-layer MLP. Weights are VMEM-resident."""
    x = x_ref[...]
    # fc1 + ReLU
    h1 = jnp.dot(x, w1_ref[...], preferred_element_type=jnp.float32) + b1_ref[...]
    h1 = jnp.maximum(h1, 0.0)
    # fc2 + ReLU
    h2 = jnp.dot(h1, w2_ref[...], preferred_element_type=jnp.float32) + b2_ref[...]
    h2 = jnp.maximum(h2, 0.0)
    # output head, native NUM_ACTIONS width (tiny masked store << DMA saved)
    out_ref[...] = (
        jnp.dot(h2, w3_ref[...], preferred_element_type=jnp.float32) + b3_ref[...]
    )


def _choose_tile(B):
    """Balanced batch tiles: each tile <= MAX_TB, multiple of 8 rows, and at
    least 2 tiles once B >= 16 so both v7x TensorCores get work."""
    nt = pl.cdiv(B, MAX_TB)
    if B >= 16:
        nt = max(nt, 2)
    tb = _round_up(pl.cdiv(B, nt), 8)
    grid = pl.cdiv(B, tb)
    return tb, grid


def net_forward(x, params):
    """x: (B, NUM_STATES) float32 -> (B, NUM_ACTIONS) float32."""
    w1, b1, w2, b2, w3, b3 = params
    x = x.astype(jnp.float32)
    B = x.shape[0]

    TB, nsteps = _choose_tile(B)

    # Scheduling hint: real flops / bytes for the whole batched call.
    flops = 2 * B * (NUM_STATES * HIDDEN1 + HIDDEN1 * HIDDEN2 + HIDDEN2 * NUM_ACTIONS)
    weight_bytes = 4 * (
        NUM_STATES * HIDDEN1 + HIDDEN1
        + HIDDEN1 * HIDDEN2 + HIDDEN2
        + HIDDEN2 * NUM_ACTIONS + NUM_ACTIONS
    )
    bytes_accessed = 4 * B * (NUM_STATES + NUM_ACTIONS) + weight_bytes

    resident = lambda shape: pl.BlockSpec(shape, lambda i: (0, 0))  # VMEM-resident

    out = pl.pallas_call(
        _mlp_kernel,
        out_shape=jax.ShapeDtypeStruct((B, NUM_ACTIONS), jnp.float32),
        grid_spec=pltpu.PrefetchScalarGridSpec(
            num_scalar_prefetch=0,
            grid=(nsteps,),
            in_specs=[
                pl.BlockSpec((TB, NUM_STATES), lambda i: (i, 0)),   # x tile
                resident((NUM_STATES, HIDDEN1)),                    # w1
                resident((1, HIDDEN1)),                             # b1
                resident((HIDDEN1, HIDDEN2)),                       # w2
                resident((1, HIDDEN2)),                             # b2
                resident((HIDDEN2, NUM_ACTIONS)),                   # w3
                resident((1, NUM_ACTIONS)),                         # b3
            ],
            out_specs=pl.BlockSpec((TB, NUM_ACTIONS), lambda i: (i, 0)),
        ),
        compiler_params=pltpu.CompilerParams(
            dimension_semantics=("parallel",),  # megacore shard on v7x
        ),
        cost_estimate=pl.CostEstimate(
            flops=flops, transcendentals=0, bytes_accessed=bytes_accessed
        ),
    )(x, w1, b1, w2, b2, w3, b3)

    return out


def init_params(key):
    """Deterministic init matching the module's __init__ semantics:
    weights ~ Normal(0, 0.1); biases use PyTorch Linear default
    U(-1/sqrt(fan_in), 1/sqrt(fan_in))."""
    ks = jax.random.split(key, 6)

    def linear(kw, kb, fan_in, fan_out):
        w = 0.1 * jax.random.normal(kw, (fan_in, fan_out), dtype=jnp.float32)
        bound = 1.0 / jnp.sqrt(jnp.float32(fan_in))
        # biases kept 2D (1, fan_out) for clean TPU broadcasting along lanes
        b = jax.random.uniform(kb, (1, fan_out), dtype=jnp.float32,
                               minval=-bound, maxval=bound)
        return w, b

    w1, b1 = linear(ks[0], ks[1], NUM_STATES, HIDDEN1)
    w2, b2 = linear(ks[2], ks[3], HIDDEN1, HIDDEN2)
    w3, b3 = linear(ks[4], ks[5], HIDDEN2, NUM_ACTIONS)
    return (w1, b1, w2, b2, w3, b3)


def _reference(x, params):
    w1, b1, w2, b2, w3, b3 = params
    h1 = jnp.maximum(x @ w1 + b1, 0.0)
    h2 = jnp.maximum(h1 @ w2 + b2, 0.0)
    return h2 @ w3 + b3


if __name__ == "__main__":
    key = jax.random.PRNGKey(0)
    pkey, xkey, xkey2 = jax.random.split(key, 3)
    params = init_params(pkey)

    # Small batch (exercises the single partial-tile path: 2 rows in an 8-row tile).
    batch = 2
    x = jax.random.normal(xkey, (batch, NUM_STATES), dtype=jnp.float32)
    out = net_forward(x, params)
    jax.block_until_ready(out)
    assert out.shape == (batch, NUM_ACTIONS)
    assert jnp.allclose(out, _reference(x, params), atol=1e-5, rtol=1e-5)

    # Larger, non-multiple batch (exercises balanced 2-tile grid with a partial
    # last tile: 1000 rows -> TB=504, grid=2).
    big = 1000
    xb = jax.random.normal(xkey2, (big, NUM_STATES), dtype=jnp.float32)
    outb = net_forward(xb, params)
    jax.block_until_ready(outb)
    assert outb.shape == (big, NUM_ACTIONS)
    assert jnp.allclose(outb, _reference(xb, params), atol=1e-4, rtol=1e-4)

    print("KERNEL_OK")
</pallas_src>

<mosaic_0001>
module attributes {stable_mosaic.version = 11 : i64} {
  func.func @_mlp_kernel(%arg0: i32, %arg1: memref<8x8xf32, #tpu.memory_space<vmem>>, %arg2: memref<8x50xf32, #tpu.memory_space<vmem>>, %arg3: memref<1x50xf32, #tpu.memory_space<vmem>>, %arg4: memref<50x30xf32, #tpu.memory_space<vmem>>, %arg5: memref<1x30xf32, #tpu.memory_space<vmem>>, %arg6: memref<30x4xf32, #tpu.memory_space<vmem>>, %arg7: memref<1x4xf32, #tpu.memory_space<vmem>>, %arg8: memref<8x4xf32, #tpu.memory_space<vmem>>) attributes {dimension_semantics = [#tpu.dimension_semantics<parallel>], iteration_bounds = array<i64: 1>, scalar_prefetch = 0 : i64, scratch_operands = 0 : i64, tpu.core_type = #tpu.core_type<tc>, window_params = [{transform_indices = @transform_0, window_bounds = array<i64: 8, 8>}, {pipeline_mode = #tpu.pipeline_mode<synchronous>, transform_indices = @transform_1, window_bounds = array<i64: 8, 50>}, {pipeline_mode = #tpu.pipeline_mode<synchronous>, transform_indices = @transform_2, window_bounds = array<i64: 1, 50>}, {pipeline_mode = #tpu.pipeline_mode<synchronous>, transform_indices = @transform_3, window_bounds = array<i64: 50, 30>}, {pipeline_mode = #tpu.pipeline_mode<synchronous>, transform_indices = @transform_4, window_bounds = array<i64: 1, 30>}, {pipeline_mode = #tpu.pipeline_mode<synchronous>, transform_indices = @transform_5, window_bounds = array<i64: 30, 4>}, {pipeline_mode = #tpu.pipeline_mode<synchronous>, transform_indices = @transform_6, window_bounds = array<i64: 1, 4>}, {transform_indices = @transform_7, window_bounds = array<i64: 8, 4>}]} {
    %c0 = arith.constant 0 : index
    %c0_0 = arith.constant 0 : index
    %0 = vector.load %arg1[%c0, %c0_0] : memref<8x8xf32, #tpu.memory_space<vmem>>, vector<8x8xf32>
    %c0_1 = arith.constant 0 : index
    %c0_2 = arith.constant 0 : index
    %1 = vector.load %arg2[%c0_1, %c0_2] : memref<8x50xf32, #tpu.memory_space<vmem>>, vector<8x50xf32>
    %cst = arith.constant dense<0.000000e+00> : vector<8x50xf32>
    %2 = tpu.matmul %0, %1, %cst {dimension_numbers = #tpu.dot_dimension_numbers<[1], [0], [0], [1], [0, 0, 1, 1], [], []>} : vector<8x8xf32>, vector<8x50xf32>, vector<8x50xf32> -> vector<8x50xf32>
    %c0_3 = arith.constant 0 : index
    %c0_4 = arith.constant 0 : index
    %3 = vector.load %arg3[%c0_3, %c0_4] : memref<1x50xf32, #tpu.memory_space<vmem>>, vector<1x50xf32>
    %4 = vector.broadcast %3 : vector<1x50xf32> to vector<8x50xf32>
    %5 = arith.addf %2, %4 : vector<8x50xf32>
    %cst_5 = arith.constant 0.000000e+00 : f32
    %6 = vector.broadcast %cst_5 : f32 to vector<8x50xf32>
    %7 = arith.maximumf %5, %6 : vector<8x50xf32>
    %c0_6 = arith.constant 0 : index
    %c0_7 = arith.constant 0 : index
    %8 = vector.load %arg4[%c0_6, %c0_7] : memref<50x30xf32, #tpu.memory_space<vmem>>, vector<50x30xf32>
    %cst_8 = arith.constant dense<0.000000e+00> : vector<8x30xf32>
    %9 = tpu.matmul %7, %8, %cst_8 {dimension_numbers = #tpu.dot_dimension_numbers<[1], [0], [0], [1], [0, 0, 1, 1], [], []>} : vector<8x50xf32>, vector<50x30xf32>, vector<8x30xf32> -> vector<8x30xf32>
    %c0_9 = arith.constant 0 : index
    %c0_10 = arith.constant 0 : index
    %10 = vector.load %arg5[%c0_9, %c0_10] : memref<1x30xf32, #tpu.memory_space<vmem>>, vector<1x30xf32>
    %11 = vector.broadcast %10 : vector<1x30xf32> to vector<8x30xf32>
    %12 = arith.addf %9, %11 : vector<8x30xf32>
    %cst_11 = arith.constant 0.000000e+00 : f32
    %13 = vector.broadcast %cst_11 : f32 to vector<8x30xf32>
    %14 = arith.maximumf %12, %13 : vector<8x30xf32>
    %c0_12 = arith.constant 0 : index
    %c0_13 = arith.constant 0 : index
    %15 = vector.load %arg6[%c0_12, %c0_13] : memref<30x4xf32, #tpu.memory_space<vmem>>, vector<30x4xf32>
    %cst_14 = arith.constant dense<0.000000e+00> : vector<8x4xf32>
    %16 = tpu.matmul %14, %15, %cst_14 {dimension_numbers = #tpu.dot_dimension_numbers<[1], [0], [0], [1], [0, 0, 1, 1], [], []>} : vector<8x30xf32>, vector<30x4xf32>, vector<8x4xf32> -> vector<8x4xf32>
    %c0_15 = arith.constant 0 : index
    %c0_16 = arith.constant 0 : index
    %17 = vector.load %arg7[%c0_15, %c0_16] : memref<1x4xf32, #tpu.memory_space<vmem>>, vector<1x4xf32>
    %18 = vector.broadcast %17 : vector<1x4xf32> to vector<8x4xf32>
    %19 = arith.addf %16, %18 : vector<8x4xf32>
    %c0_17 = arith.constant 0 : index
    %c0_18 = arith.constant 0 : index
    %20 = vector.load %arg8[%c0_17, %c0_18] : memref<8x4xf32, #tpu.memory_space<vmem>>, vector<8x4xf32>
    tpu.vector_store %arg8[%c0_17, %c0_18], %19 {strides = array<i32>} : memref<8x4xf32, #tpu.memory_space<vmem>>, vector<8x4xf32>,
    return
  }
  func.func @transform_0(%arg0: i32) -> (i32, i32) {
    %c0_i32 = arith.constant 0 : i32
    %c0_i32_0 = arith.constant 0 : i32
    return %arg0, %c0_i32 : i32, i32
  }
  func.func @transform_1(%arg0: i32) -> (i32, i32) {
    %c0_i32 = arith.constant 0 : i32
    %c0_i32_0 = arith.constant 0 : i32
    %c0_i32_1 = arith.constant 0 : i32
    return %c0_i32, %c0_i32_0 : i32, i32
  }
  func.func @transform_2(%arg0: i32) -> (i32, i32) {
    %c0_i32 = arith.constant 0 : i32
    %c0_i32_0 = arith.constant 0 : i32
    %c0_i32_1 = arith.constant 0 : i32
    return %c0_i32, %c0_i32_0 : i32, i32
  }
  func.func @transform_3(%arg0: i32) -> (i32, i32) {
    %c0_i32 = arith.constant 0 : i32
    %c0_i32_0 = arith.constant 0 : i32
    %c0_i32_1 = arith.constant 0 : i32
    return %c0_i32, %c0_i32_0 : i32, i32
  }
  func.func @transform_4(%arg0: i32) -> (i32, i32) {
    %c0_i32 = arith.constant 0 : i32
    %c0_i32_0 = arith.constant 0 : i32
    %c0_i32_1 = arith.constant 0 : i32
    return %c0_i32, %c0_i32_0 : i32, i32
  }
  func.func @transform_5(%arg0: i32) -> (i32, i32) {
    %c0_i32 = arith.constant 0 : i32
    %c0_i32_0 = arith.constant 0 : i32
    %c0_i32_1 = arith.constant 0 : i32
    return %c0_i32, %c0_i32_0 : i32, i32
  }
  func.func @transform_6(%arg0: i32) -> (i32, i32) {
    %c0_i32 = arith.constant 0 : i32
    %c0_i32_0 = arith.constant 0 : i32
    %c0_i32_1 = arith.constant 0 : i32
    return %c0_i32, %c0_i32_0 : i32, i32
  }
  func.func @transform_7(%arg0: i32) -> (i32, i32) {
    %c0_i32 = arith.constant 0 : i32
    %c0_i32_0 = arith.constant 0 : i32
    return %arg0, %c0_i32 : i32, i32
  }
}

</mosaic_0001>

<bundles_post_ra>
// kernel: tpu_custom_call.1
= control target key start
LH: loop header
LB: loop body
LE: loop exit
PB: predicated region body
PF: predicated region fallthrough
CT: control target
= control target key end

     0   :  { %12 = vsyncpa [#allocation3], 0  ;;  %vm33_vm0 = vcmask 64512   ;;  %vm73_vm1 = vcmask 1041408   ;;  %vm110_vm2 = vcmask 1045504   ;;  %vm69_vm3 = vcmask 408576   ;;  %s285_s0 = inlined_call_operand.vmem [shape: f32[2,8], index: 0, kind: input, shape index: {}]   ;;  %s286_s1 = inlined_call_operand.vmem [shape: f32[8,50], index: 1, kind: input, shape index: {}]   ;;  %s287_s2 = inlined_call_operand.vmem [shape: f32[1,50], index: 2, kind: input, shape index: {}]   ;;  %s288_s3 = inlined_call_operand.vmem [shape: f32[50,30], index: 3, kind: input, shape index: {}]   ;;  %s289_s4 = inlined_call_operand.vmem [shape: f32[1,30], index: 4, kind: input, shape index: {}]   ;;  %s290_s5 = inlined_call_operand.vmem [shape: f32[30,4], index: 5, kind: input, shape index: {}]   ;;  %s291_s6 = inlined_call_operand.vmem [shape: f32[1,4], index: 6, kind: input, shape index: {}]   ;;  %s292_s7 = inlined_call_operand.hbm [shape: f32[2,4], index: 7, kind: output, shape index: {}]  }
   0x1   :  { %v28_v0 = vld [vmem:[%s286_s1] sm:$0xff]  ;;  %v64_v2 = vld [vmem:[%s288_s3 + $0x30] sm:$0x3]  ;;  %v63_v3 = vld [vmem:[%s288_s3 + $0x28] sm:$0xff]  ;;  %vm106_vm4 = vcmask 244736   ;;  %vm134_vm5 = vcmask 31744  }
   0x2   :  { %v27_v1 = vld [vmem:[%s285_s0] sm:$0xff]  ;;  %52 = vmatpush.msra.mxu0 %v28_v0  ;;  %155 = vmatpush.msk.msra.mxu1 %vm73_vm1, %v64_v2  ;;  %v61_v5 = vld [vmem:[%s288_s3 + $0x18] sm:$0xff]  ;;  %v60_v6 = vld [vmem:[%s288_s3 + $0x10] sm:$0xff] }
   0x3   :  { %154 = vmatmul.msk.f32.vlgmr.msra.gmra.mxu0 %vm33_vm0, %v27_v1  ;;  %v62_v4 = vld [vmem:[%s288_s3 + $0x20] sm:$0xff]  ;;  %v59_v7 = vld [vmem:[%s288_s3 + $0x8] sm:$0xff]  ;;  %v101_v9 = vld [vmem:[%s290_s5 + $0x18] sm:$0x3f] }
   0x4   :  { %87 = vmatpush.msra.mxu1 %v63_v3  ;;  %v58_v8 = vld [vmem:[%s288_s3] sm:$0xff]  ;;  %157 = vmatpush.msk.msra.mxu2 %vm110_vm2, %v101_v9  ;;  %v100_v14 = vld [vmem:[%s290_s5 + $0x10] sm:$0xff]  ;;  %v99_v15 = vld [vmem:[%s290_s5 + $0x8] sm:$0xff] }
   0x5   :  { %v162_v10 = vld [vmem:[%s287_s2] ss:$0 sm:$0xff] }
   0x6   :  { %88 = vmatpush.msra.mxu1 %v62_v4  ;;  %127 = vmatpush.msra.mxu2 %v100_v14  ;;  %v98_v16 = vld [vmem:[%s290_s5] sm:$0xff] }
   0x7   :  { %v163_v17 = vld [vmem:[%s289_s4] ss:$0 sm:$0xff] }
   0x8   :  { %89 = vmatpush.msra.mxu1 %v61_v5  ;;  %128 = vmatpush.msra.mxu2 %v99_v15  ;;  %v164_v21 = vld [vmem:[%s291_s6] ss:$0 sm:$0xff] }
   0xa   :  { %90 = vmatpush.msra.mxu1 %v60_v6  ;;  %129 = vmatpush.msra.mxu2 %v98_v16 }
   0xc   :  { %91 = vmatpush.msra.mxu1 %v59_v7 }
   0xe   :  { %92 = vmatpush.msra.mxu1 %v58_v8 }
  0x80   :  { %v54_v11 = vpop.f32.mrf.mxu0 }
  0x81   :  { %v55_v12 = vadd.f32 %v162_v10, %v54_v11 }
  0x83   :  { %v57_v13 = vmax.f32 %v55_v12, 0.0 }
  0x85   :  { %156 = vmatmul.msk.f32.vlgmr.msra.gmra.mxu1 %vm69_vm3, %v57_v13 }
 0x102   :  { %v94_v18 = vpop.f32.mrf.mxu1 }
 0x103   :  { %v95_v19 = vadd.f32 %v163_v17, %v94_v18 }
 0x105   :  { %v97_v20 = vmax.f32 %v95_v19, 0.0 }
 0x107   :  { %158 = vmatmul.msk.f32.vlgmr.msra.gmra.mxu2 %vm106_vm4, %v97_v20 }
 0x18a   :  { %v131_v22 = vpop.f32.mrf.mxu2 }
 0x18b   :  { %v132_v23 = vadd.f32 %v164_v21, %v131_v22 }
 0x18d   :  { %135 = vst.msk [vmem:[#allocation2] sm:$0xff] %vm134_vm5, %v132_v23 }
 0x18e   :  { %139 = vsyncadd [#allocation3], 96  ;;  %s142_s30 = sshll.u32 %s292_s7, 4  ;;  %s191_s8 = smov [#allocation2]   ;;  %s143_s30 = int_to_ptr.hbm [resolvable:$true] %s142_s30 }
 0x18f   :  { %s140_s4 = sshll.u32 %s191_s8, 4  ;;  %s192_s9 = smov 32   ;;  %s141_s4 = int_to_ptr.vmem [resolvable:$true] %s140_s4 }
 0x190   :  { %s193_s10 = smov 2  }
 0x191   :  { %148 = dma.vmem_to_hbm [thread:$0]  %s141_s4, 32, %s143_s30, [#allocation3], %s192_s9, %s192_s9, %s193_s10  }
 0x192   :  { %189 = dma.done.wait [#allocation3], 128  }
 0x193   :  { %190 = vsyncadd [#allocation3], 4294967168 }
 0x194   :  { %153 = vsyncpa [#allocation3], 1 }

</bundles_post_ra>
